<compile_context>
chip_gen: v6e
topology: v6e:2x2x1
jax: 0.10.0
libtpu: 0.0.40
codegen_flags: <defaults>
</compile_context>

<pallas_src>
from collections import namedtuple
from functools import partial

import jax
import jax.numpy as jnp
from jax.experimental import pallas as pl
from jax.experimental.pallas import tpu as pltpu

MLAEOutput = namedtuple("MLAEOutput", ["out"])


# ----------------------------------------------------------------------------
# Fused kernel: patch-embed + transformer block + mean-pool
# ----------------------------------------------------------------------------
def _layernorm(x, g, b, eps=1e-5):
    mu = jnp.mean(x, axis=-1, keepdims=True)
    var = jnp.mean(jnp.square(x - mu), axis=-1, keepdims=True)
    return (x - mu) * jax.lax.rsqrt(var + eps) * g + b


def _mlae_fused_kernel(
    xp_ref,                          # (BB, N, C*P)  bf16 patch rows, this block
    pw_ref,                          # (C*P, D)      bf16 patch-embed weight
    posb_ref,                        # (BB*N, D)     f32  patch bias + pos, tiled
    ln1g_ref, ln1b_ref,              # (1, D)        f32
    wqkv_ref, bqkv_ref,              # (D, 3D) bf16 (q cols pre-scaled), (1, 3D)
    wo_ref, bo_ref,                  # (D, D) bf16, (1, D) f32
    ln2g_ref, ln2b_ref,              # (1, D)
    w1_ref, b1_ref, w2_ref, b2_ref,  # MLP
    out_ref,                         # (BB, N, D)
    emb_ref,                         # (BB, 1, D)  mean over N (AdaptiveAvgPool1d(1))
    *, num_heads,
):
    bb, n, cp = xp_ref.shape
    d = ln1g_ref.shape[-1]
    hd = d // num_heads
    m = bb * n
    f32, bf16 = jnp.float32, jnp.bfloat16

    # ---- patch embedding: one (M, C*P) @ (C*P, D) MXU matmul -----------------
    # patch bias + positional embedding arrive pre-summed & pre-tiled (M, D).
    rows = xp_ref[...].reshape(m, cp).astype(bf16)
    x = jnp.dot(rows, pw_ref[...], preferred_element_type=f32) + posb_ref[...]

    # ---- self-attention -------------------------------------------------------
    xln = _layernorm(x, ln1g_ref[...], ln1b_ref[...])
    # ONE fused QKV matmul; 1/sqrt(hd) already folded into the q columns/bias.
    qkv = jnp.dot(xln.astype(bf16), wqkv_ref[...],
                  preferred_element_type=f32) + bqkv_ref[...]          # (M, 3D)

    def gather_heads(col0):
        # Per-head column slices -> (BB*H, N, hd) head-batch. Only leading-axis
        # stacks / reshapes: no sublane-crossing transpose.
        parts = [qkv[:, col0 + h * hd: col0 + (h + 1) * hd].reshape(bb, n, hd)
                 for h in range(num_heads)]
        return jnp.stack(parts, axis=1).reshape(bb * num_heads, n, hd)

    q = gather_heads(0).astype(bf16)
    k = gather_heads(d).astype(bf16)
    v = gather_heads(2 * d).astype(bf16)

    # batched over g = BB*H -> no Python batch loop, no cross-batch attention.
    s = jnp.einsum("gqd,gkd->gqk", q, k, preferred_element_type=f32)
    s = s - jnp.max(s, axis=-1, keepdims=True)
    p = jnp.exp(s)
    p = p * pl.reciprocal(jnp.sum(p, axis=-1, keepdims=True), approx=True)
    o = jnp.einsum("gqk,gkd->gqd", p.astype(bf16), v,
                   preferred_element_type=f32)                         # (G, N, hd)

    # merge heads back to (M, D) (lane-axis concat), then ONE K=D output proj.
    o4 = o.reshape(bb, num_heads, n, hd)
    o_m = jnp.concatenate([o4[:, h].reshape(m, hd) for h in range(num_heads)],
                          axis=-1)                                     # (M, D)
    attn = jnp.dot(o_m.astype(bf16), wo_ref[...],
                   preferred_element_type=f32) + bo_ref[...]
    x = x + attn

    # ---- MLP ------------------------------------------------------------------
    xln2 = _layernorm(x, ln2g_ref[...], ln2b_ref[...])
    h = jnp.dot(xln2.astype(bf16), w1_ref[...],
                preferred_element_type=f32) + b1_ref[...]
    # TODO(synk): PyTorch nn.GELU default is exact erf; tanh approximation kept
    # here for guaranteed Mosaic lowering (use approximate=False for bit parity).
    h = jax.nn.gelu(h)
    h = jnp.dot(h.astype(bf16), w2_ref[...],
                preferred_element_type=f32) + b2_ref[...]
    x = x + h

    # ---- outputs: tokens + pooled embedding (fused mean over sequence) -------
    x3 = x.reshape(bb, n, d)
    out_ref[...] = x3.astype(out_ref.dtype)
    emb_ref[...] = jnp.mean(x3, axis=1, keepdims=True).astype(emb_ref.dtype)


# ----------------------------------------------------------------------------
# Wrapper / pallas_call
# ----------------------------------------------------------------------------
def _rep_spec(arr):
    zeros = (0,) * arr.ndim
    return pl.BlockSpec(arr.shape, lambda i, _z=zeros: _z)


def mlae_fused_call(x_patches, fp, *, num_heads, batch_block, out_dtype):
    b, n, cp = x_patches.shape
    d = fp["ln1_g"].shape[-1]
    bb = batch_block
    assert b % bb == 0, "batch_block must divide batch"

    # patch bias + pos pre-summed in prepare_params; tile once over the batch
    # block here (tiny wrapper-side XLA op) so the kernel does a plain 2-D add.
    posb = jnp.tile(fp["pos_bias"], (bb, 1))                  # (bb*n, d)

    weight_arrays = [
        fp["patch_w"], posb, fp["ln1_g"], fp["ln1_b"],
        fp["wqkv"], fp["bqkv"], fp["wo"], fp["bo"],
        fp["ln2_g"], fp["ln2_b"],
        fp["mlp_w1"], fp["mlp_b1"], fp["mlp_w2"], fp["mlp_b2"],
    ]
    in_specs = [pl.BlockSpec((bb, n, cp), lambda i: (i, 0, 0))]
    in_specs += [_rep_spec(a) for a in weight_arrays]

    kernel = partial(_mlae_fused_kernel, num_heads=num_heads)
    out, emb = pl.pallas_call(
        kernel,
        out_shape=(jax.ShapeDtypeStruct((b, n, d), out_dtype),
                   jax.ShapeDtypeStruct((b, 1, d), jnp.float32)),
        grid=(b // bb,),
        in_specs=in_specs,
        out_specs=(pl.BlockSpec((bb, n, d), lambda i: (i, 0, 0)),
                   pl.BlockSpec((bb, 1, d), lambda i: (i, 0, 0))),
        compiler_params=pltpu.CompilerParams(
            dimension_semantics=("parallel",),
            # Explicit scoped-VMEM limit: well inside v5e/v6e's 128 MiB,
            # == v7x physical (at real sizes tile attention/MLP instead).
            vmem_limit_bytes=64 * 1024 * 1024),
    )(x_patches, *weight_arrays)
    return out, emb


def patchify(signal, patch):
    # Conv1d(C, D, kernel=stride=patch) == matmul on non-overlapping patches.
    b, c, l = signal.shape
    assert l % patch == 0, "signal length must be a multiple of the patch size"
    n = l // patch
    xp = (signal.reshape(b, c, n, patch)
                .transpose(0, 2, 1, 3)
                .reshape(b, n, c * patch))
    # bf16 feed is numerically identical (kernel casts to bf16 at the MXU dot
    # anyway) and halves the HBM read of the patch stream.
    return xp.astype(jnp.bfloat16)


@partial(jax.jit, static_argnames=("patch", "num_heads", "batch_block", "out_dtype"))
def mlae_apply(signal, fused_params, *, patch, num_heads, batch_block, out_dtype):
    xp = patchify(signal, patch)
    return mlae_fused_call(xp, fused_params, num_heads=num_heads,
                           batch_block=batch_block, out_dtype=out_dtype)


def _default_batch_block(b, n, *, target_rows=512, min_grid=2):
    """Grow bb toward ~target_rows rows/step (amortize step overhead, feed the
    MXU on v5e/v6e) while keeping grid = b//bb >= min_grid so both v7x
    TensorCores get work under 'parallel' semantics."""
    best = 1
    for cand in range(1, b + 1):
        if b % cand:
            continue
        if b >= min_grid and b // cand < min_grid:
            continue                      # would leave a v7x TensorCore idle
        if cand * n > 4 * target_rows:
            break                         # don't blow up VMEM
        best = cand
        if cand * n >= target_rows:
            break
    return best


# ----------------------------------------------------------------------------
# Parameter preparation: fuse QKV columns, fold scale, pre-sum pos bias,
# cast matmul weights to bf16.
# ----------------------------------------------------------------------------
def prepare_params(p, num_heads, matmul_dtype=jnp.bfloat16):
    d = p["wq"].shape[0]
    assert d % num_heads == 0
    hd = d // num_heads
    scale = 1.0 / float(hd) ** 0.5

    # ONE (D, 3D) QKV weight, columns ordered [q | k | v], each [head, hd];
    # 1/sqrt(hd) folded into the q columns / bias.
    wqkv = jnp.concatenate([p["wq"] * scale, p["wk"], p["wv"]], axis=1)  # (D, 3D)
    bqkv = jnp.concatenate([p["bq"] * scale, p["bk"], p["bv"]], axis=1)  # (1, 3D)
    pos_bias = p["pos"] + p["patch_b"]                                    # (N, D)

    mm = lambda w: w.astype(matmul_dtype)
    f32 = lambda w: w.astype(jnp.float32)
    return {
        "patch_w": mm(p["patch_w"]),
        "pos_bias": f32(pos_bias),
        "ln1_g": f32(p["ln1_g"]), "ln1_b": f32(p["ln1_b"]),
        "wqkv": mm(wqkv), "bqkv": f32(bqkv),
        "wo": mm(p["wo"]), "bo": f32(p["bo"]),
        "ln2_g": f32(p["ln2_g"]), "ln2_b": f32(p["ln2_b"]),
        "mlp_w1": mm(p["mlp_w1"]), "mlp_b1": f32(p["mlp_b1"]),
        "mlp_w2": mm(p["mlp_w2"]), "mlp_b2": f32(p["mlp_b2"]),
    }


class MLAE_Ours_Pallas:
    """JAX/Pallas port of MLAE_Ours (forward + get_embeddings)."""

    def __init__(self, params, patch, num_heads, batch_block=None,
                 matmul_dtype=jnp.bfloat16, out_dtype=jnp.bfloat16):
        # out_dtype=jnp.float32 for strict parity with the fp32 PyTorch output;
        # bf16 halves the dominant (B, N, D) HBM writeback.
        self.patch = patch
        self.num_heads = num_heads
        self.batch_block = batch_block
        self.out_dtype = out_dtype
        self.fused_params = prepare_params(params, num_heads, matmul_dtype)

    def _run(self, signal):
        b, _, l = signal.shape
        n = l // self.patch
        bb = self.batch_block or _default_batch_block(b, n)
        return mlae_apply(signal, self.fused_params, patch=self.patch,
                          num_heads=self.num_heads, batch_block=bb,
                          out_dtype=self.out_dtype)

    def forward(self, batch):
        out, _ = self._run(batch["signal"])
        return MLAEOutput(out=out)

    def get_embeddings(self, batch):
        # out.permute(0,2,1) -> AdaptiveAvgPool1d(1) -> squeeze(-1)
        _, emb = self._run(batch["signal"])
        return emb[:, 0, :]


# ----------------------------------------------------------------------------
# Deterministic parameter init (standard / unfused layout)
# ----------------------------------------------------------------------------
def init_params(key, c, patch, n, d, num_heads, mlp):
    ks = jax.random.split(key, 16)
    w = lambda k, shape: (0.02 * jax.random.normal(k, shape)).astype(jnp.float32)
    z = lambda shape: jnp.zeros(shape, jnp.float32)
    o = lambda shape: jnp.ones(shape, jnp.float32)
    return {
        "patch_w": w(ks[0], (c * patch, d)), "patch_b": z((1, d)),
        "pos": w(ks[1], (n, d)),
        "ln1_g": o((1, d)), "ln1_b": z((1, d)),
        "wq": w(ks[2], (d, d)), "bq": z((1, d)),
        "wk": w(ks[3], (d, d)), "bk": z((1, d)),
        "wv": w(ks[4], (d, d)), "bv": z((1, d)),
        "wo": w(ks[5], (d, d)), "bo": z((1, d)),
        "ln2_g": o((1, d)), "ln2_b": z((1, d)),
        "mlp_w1": w(ks[6], (d, mlp)), "mlp_b1": z((1, mlp)),
        "mlp_w2": w(ks[7], (mlp, d)), "mlp_b2": z((1, d)),
    }


if __name__ == "__main__":
    B, C, L = 2, 4, 64          # batch, ECG leads, signal length
    PATCH, D, HEADS, MLP = 8, 32, 4, 64
    N = L // PATCH

    key = jax.random.PRNGKey(0)
    k_sig, k_par = jax.random.split(key)
    signal = jax.random.normal(k_sig, (B, C, L), dtype=jnp.float32)
    base_params = init_params(k_par, C, PATCH, N, D, HEADS, MLP)

    model = MLAE_Ours_Pallas(base_params, patch=PATCH, num_heads=HEADS)
    batch = {"signal": signal}

    out = model.forward(batch)                 # MLAEOutput(out=(B, N, D))
    emb = model.get_embeddings(batch)          # (B, D)

    jax.block_until_ready(out.out)
    jax.block_until_ready(emb)
    assert out.out.shape == (B, N, D)
    assert emb.shape == (B, D)
    assert bool(jnp.all(jnp.isfinite(out.out.astype(jnp.float32))))
    assert bool(jnp.all(jnp.isfinite(emb)))
    print("KERNEL_OK")
</pallas_src>

<mosaic_0001>
module attributes {stable_mosaic.version = 11 : i64} {
  func.func @_mlae_fused_kernel(%arg0: i32, %arg1: memref<1x8x32xbf16, #tpu.memory_space<vmem>>, %arg2: memref<32x32xbf16, #tpu.memory_space<vmem>>, %arg3: memref<8x32xf32, #tpu.memory_space<vmem>>, %arg4: memref<1x32xf32, #tpu.memory_space<vmem>>, %arg5: memref<1x32xf32, #tpu.memory_space<vmem>>, %arg6: memref<32x96xbf16, #tpu.memory_space<vmem>>, %arg7: memref<1x96xf32, #tpu.memory_space<vmem>>, %arg8: memref<32x32xbf16, #tpu.memory_space<vmem>>, %arg9: memref<1x32xf32, #tpu.memory_space<vmem>>, %arg10: memref<1x32xf32, #tpu.memory_space<vmem>>, %arg11: memref<1x32xf32, #tpu.memory_space<vmem>>, %arg12: memref<32x64xbf16, #tpu.memory_space<vmem>>, %arg13: memref<1x64xf32, #tpu.memory_space<vmem>>, %arg14: memref<64x32xbf16, #tpu.memory_space<vmem>>, %arg15: memref<1x32xf32, #tpu.memory_space<vmem>>, %arg16: memref<1x8x32xbf16, #tpu.memory_space<vmem>>, %arg17: memref<1x1x32xf32, #tpu.memory_space<vmem>>) attributes {dimension_semantics = [#tpu.dimension_semantics<parallel>], iteration_bounds = array<i64: 2>, scalar_prefetch = 0 : i64, scratch_operands = 0 : i64, tpu.core_type = #tpu.core_type<tc>, window_params = [{transform_indices = @transform_0, window_bounds = array<i64: 1, 8, 32>}, {pipeline_mode = #tpu.pipeline_mode<synchronous>, transform_indices = @transform_1, window_bounds = array<i64: 32, 32>}, {pipeline_mode = #tpu.pipeline_mode<synchronous>, transform_indices = @transform_2, window_bounds = array<i64: 8, 32>}, {pipeline_mode = #tpu.pipeline_mode<synchronous>, transform_indices = @transform_3, window_bounds = array<i64: 1, 32>}, {pipeline_mode = #tpu.pipeline_mode<synchronous>, transform_indices = @transform_4, window_bounds = array<i64: 1, 32>}, {pipeline_mode = #tpu.pipeline_mode<synchronous>, transform_indices = @transform_5, window_bounds = array<i64: 32, 96>}, {pipeline_mode = #tpu.pipeline_mode<synchronous>, transform_indices = @transform_6, window_bounds = array<i64: 1, 96>}, {pipeline_mode = #tpu.pipeline_mode<synchronous>, transform_indices = @transform_7, window_bounds = array<i64: 32, 32>}, {pipeline_mode = #tpu.pipeline_mode<synchronous>, transform_indices = @transform_8, window_bounds = array<i64: 1, 32>}, {pipeline_mode = #tpu.pipeline_mode<synchronous>, transform_indices = @transform_9, window_bounds = array<i64: 1, 32>}, {pipeline_mode = #tpu.pipeline_mode<synchronous>, transform_indices = @transform_10, window_bounds = array<i64: 1, 32>}, {pipeline_mode = #tpu.pipeline_mode<synchronous>, transform_indices = @transform_11, window_bounds = array<i64: 32, 64>}, {pipeline_mode = #tpu.pipeline_mode<synchronous>, transform_indices = @transform_12, window_bounds = array<i64: 1, 64>}, {pipeline_mode = #tpu.pipeline_mode<synchronous>, transform_indices = @transform_13, window_bounds = array<i64: 64, 32>}, {pipeline_mode = #tpu.pipeline_mode<synchronous>, transform_indices = @transform_14, window_bounds = array<i64: 1, 32>}, {transform_indices = @transform_15, window_bounds = array<i64: 1, 8, 32>}, {transform_indices = @transform_16, window_bounds = array<i64: 1, 1, 32>}]} {
    %c0 = arith.constant 0 : index
    %c0_0 = arith.constant 0 : index
    %c0_1 = arith.constant 0 : index
    %0 = vector.load %arg1[%c0, %c0_0, %c0_1] : memref<1x8x32xbf16, #tpu.memory_space<vmem>>, vector<1x8x32xbf16>
    %1 = vector.shape_cast %0 : vector<1x8x32xbf16> to vector<8x32xbf16>
    %c0_2 = arith.constant 0 : index
    %c0_3 = arith.constant 0 : index
    %2 = vector.load %arg2[%c0_2, %c0_3] : memref<32x32xbf16, #tpu.memory_space<vmem>>, vector<32x32xbf16>
    %cst = arith.constant dense<0.000000e+00> : vector<8x32xf32>
    %3 = tpu.matmul %1, %2, %cst {dimension_numbers = #tpu.dot_dimension_numbers<[1], [0], [0], [1], [0, 0, 1, 1], [], []>} : vector<8x32xbf16>, vector<32x32xbf16>, vector<8x32xf32> -> vector<8x32xf32>
    %c0_4 = arith.constant 0 : index
    %c0_5 = arith.constant 0 : index
    %4 = vector.load %arg3[%c0_4, %c0_5] : memref<8x32xf32, #tpu.memory_space<vmem>>, vector<8x32xf32>
    %5 = arith.addf %3, %4 : vector<8x32xf32>
    %c0_6 = arith.constant 0 : index
    %c0_7 = arith.constant 0 : index
    %6 = vector.load %arg4[%c0_6, %c0_7] : memref<1x32xf32, #tpu.memory_space<vmem>>, vector<1x32xf32>
    %c0_8 = arith.constant 0 : index
    %c0_9 = arith.constant 0 : index
    %7 = vector.load %arg5[%c0_8, %c0_9] : memref<1x32xf32, #tpu.memory_space<vmem>>, vector<1x32xf32>
    %cst_10 = arith.constant dense<0.000000e+00> : vector<8xf32>
    %8 = vector.multi_reduction <add>, %5, %cst_10 [1] : vector<8x32xf32> to vector<8xf32>
    %9 = vector.shape_cast %8 : vector<8xf32> to vector<8x1xf32>
    %cst_11 = arith.constant 3.200000e+01 : f32
    %10 = vector.broadcast %cst_11 : f32 to vector<8x1xf32>
    %11 = arith.divf %9, %10 : vector<8x1xf32>
    %12 = vector.broadcast %11 : vector<8x1xf32> to vector<8x32xf32>
    %13 = arith.subf %5, %12 : vector<8x32xf32>
    %14 = arith.mulf %13, %13 : vector<8x32xf32>
    %cst_12 = arith.constant dense<0.000000e+00> : vector<8xf32>
    %15 = vector.multi_reduction <add>, %14, %cst_12 [1] : vector<8x32xf32> to vector<8xf32>
    %16 = vector.shape_cast %15 : vector<8xf32> to vector<8x1xf32>
    %cst_13 = arith.constant 3.200000e+01 : f32
    %17 = vector.broadcast %cst_13 : f32 to vector<8x1xf32>
    %18 = arith.divf %16, %17 : vector<8x1xf32>
    %19 = vector.broadcast %11 : vector<8x1xf32> to vector<8x32xf32>
    %20 = arith.subf %5, %19 : vector<8x32xf32>
    %cst_14 = arith.constant 9.99999974E-6 : f32
    %21 = vector.broadcast %cst_14 : f32 to vector<8x1xf32>
    %22 = arith.addf %18, %21 : vector<8x1xf32>
    %23 = math.rsqrt %22 : vector<8x1xf32>
    %24 = vector.broadcast %23 : vector<8x1xf32> to vector<8x32xf32>
    %25 = arith.mulf %20, %24 : vector<8x32xf32>
    %26 = vector.broadcast %6 : vector<1x32xf32> to vector<8x32xf32>
    %27 = arith.mulf %25, %26 : vector<8x32xf32>
    %28 = vector.broadcast %7 : vector<1x32xf32> to vector<8x32xf32>
    %29 = arith.addf %27, %28 : vector<8x32xf32>
    %30 = arith.truncf %29 : vector<8x32xf32> to vector<8x32xbf16>
    %c0_15 = arith.constant 0 : index
    %c0_16 = arith.constant 0 : index
    %31 = vector.load %arg6[%c0_15, %c0_16] : memref<32x96xbf16, #tpu.memory_space<vmem>>, vector<32x96xbf16>
    %cst_17 = arith.constant dense<0.000000e+00> : vector<8x96xf32>
    %32 = tpu.matmul %30, %31, %cst_17 {dimension_numbers = #tpu.dot_dimension_numbers<[1], [0], [0], [1], [0, 0, 1, 1], [], []>} : vector<8x32xbf16>, vector<32x96xbf16>, vector<8x96xf32> -> vector<8x96xf32>
    %c0_18 = arith.constant 0 : index
    %c0_19 = arith.constant 0 : index
    %33 = vector.load %arg7[%c0_18, %c0_19] : memref<1x96xf32, #tpu.memory_space<vmem>>, vector<1x96xf32>
    %34 = vector.broadcast %33 : vector<1x96xf32> to vector<8x96xf32>
    %35 = arith.addf %32, %34 : vector<8x96xf32>
    %36 = vector.extract_strided_slice %35 {offsets = [0, 0], sizes = [8, 8], strides = [1, 1]} : vector<8x96xf32> to vector<8x8xf32>
    %37 = vector.shape_cast %36 : vector<8x8xf32> to vector<1x8x8xf32>
    %38 = vector.extract_strided_slice %35 {offsets = [0, 8], sizes = [8, 8], strides = [1, 1]} : vector<8x96xf32> to vector<8x8xf32>
    %39 = vector.shape_cast %38 : vector<8x8xf32> to vector<1x8x8xf32>
    %40 = vector.extract_strided_slice %35 {offsets = [0, 16], sizes = [8, 8], strides = [1, 1]} : vector<8x96xf32> to vector<8x8xf32>
    %41 = vector.shape_cast %40 : vector<8x8xf32> to vector<1x8x8xf32>
    %42 = vector.extract_strided_slice %35 {offsets = [0, 24], sizes = [8, 8], strides = [1, 1]} : vector<8x96xf32> to vector<8x8xf32>
    %43 = vector.shape_cast %42 : vector<8x8xf32> to vector<1x8x8xf32>
    %44 = vector.shape_cast %37 : vector<1x8x8xf32> to vector<1x1x8x8xf32>
    %45 = vector.shape_cast %39 : vector<1x8x8xf32> to vector<1x1x8x8xf32>
    %46 = vector.shape_cast %41 : vector<1x8x8xf32> to vector<1x1x8x8xf32>
    %47 = vector.shape_cast %43 : vector<1x8x8xf32> to vector<1x1x8x8xf32>
    %48 = tpu.concatenate %44, %45, %46, %47 in 1 : vector<1x1x8x8xf32>, vector<1x1x8x8xf32>, vector<1x1x8x8xf32>, vector<1x1x8x8xf32> -> vector<1x4x8x8xf32>
    %49 = vector.shape_cast %48 : vector<1x4x8x8xf32> to vector<4x8x8xf32>
    %50 = arith.truncf %49 : vector<4x8x8xf32> to vector<4x8x8xbf16>
    %51 = vector.extract_strided_slice %35 {offsets = [0, 32], sizes = [8, 8], strides = [1, 1]} : vector<8x96xf32> to vector<8x8xf32>
    %52 = vector.shape_cast %51 : vector<8x8xf32> to vector<1x8x8xf32>
    %53 = vector.extract_strided_slice %35 {offsets = [0, 40], sizes = [8, 8], strides = [1, 1]} : vector<8x96xf32> to vector<8x8xf32>
    %54 = vector.shape_cast %53 : vector<8x8xf32> to vector<1x8x8xf32>
    %55 = vector.extract_strided_slice %35 {offsets = [0, 48], sizes = [8, 8], strides = [1, 1]} : vector<8x96xf32> to vector<8x8xf32>
    %56 = vector.shape_cast %55 : vector<8x8xf32> to vector<1x8x8xf32>
    %57 = vector.extract_strided_slice %35 {offsets = [0, 56], sizes = [8, 8], strides = [1, 1]} : vector<8x96xf32> to vector<8x8xf32>
    %58 = vector.shape_cast %57 : vector<8x8xf32> to vector<1x8x8xf32>
    %59 = vector.shape_cast %52 : vector<1x8x8xf32> to vector<1x1x8x8xf32>
    %60 = vector.shape_cast %54 : vector<1x8x8xf32> to vector<1x1x8x8xf32>
    %61 = vector.shape_cast %56 : vector<1x8x8xf32> to vector<1x1x8x8xf32>
    %62 = vector.shape_cast %58 : vector<1x8x8xf32> to vector<1x1x8x8xf32>
    %63 = tpu.concatenate %59, %60, %61, %62 in 1 : vector<1x1x8x8xf32>, vector<1x1x8x8xf32>, vector<1x1x8x8xf32>, vector<1x1x8x8xf32> -> vector<1x4x8x8xf32>
    %64 = vector.shape_cast %63 : vector<1x4x8x8xf32> to vector<4x8x8xf32>
    %65 = arith.truncf %64 : vector<4x8x8xf32> to vector<4x8x8xbf16>
    %66 = vector.extract_strided_slice %35 {offsets = [0, 64], sizes = [8, 8], strides = [1, 1]} : vector<8x96xf32> to vector<8x8xf32>
    %67 = vector.shape_cast %66 : vector<8x8xf32> to vector<1x8x8xf32>
    %68 = vector.extract_strided_slice %35 {offsets = [0, 72], sizes = [8, 8], strides = [1, 1]} : vector<8x96xf32> to vector<8x8xf32>
    %69 = vector.shape_cast %68 : vector<8x8xf32> to vector<1x8x8xf32>
    %70 = vector.extract_strided_slice %35 {offsets = [0, 80], sizes = [8, 8], strides = [1, 1]} : vector<8x96xf32> to vector<8x8xf32>
    %71 = vector.shape_cast %70 : vector<8x8xf32> to vector<1x8x8xf32>
    %72 = vector.extract_strided_slice %35 {offsets = [0, 88], sizes = [8, 8], strides = [1, 1]} : vector<8x96xf32> to vector<8x8xf32>
    %73 = vector.shape_cast %72 : vector<8x8xf32> to vector<1x8x8xf32>
    %74 = vector.shape_cast %67 : vector<1x8x8xf32> to vector<1x1x8x8xf32>
    %75 = vector.shape_cast %69 : vector<1x8x8xf32> to vector<1x1x8x8xf32>
    %76 = vector.shape_cast %71 : vector<1x8x8xf32> to vector<1x1x8x8xf32>
    %77 = vector.shape_cast %73 : vector<1x8x8xf32> to vector<1x1x8x8xf32>
    %78 = tpu.concatenate %74, %75, %76, %77 in 1 : vector<1x1x8x8xf32>, vector<1x1x8x8xf32>, vector<1x1x8x8xf32>, vector<1x1x8x8xf32> -> vector<1x4x8x8xf32>
    %79 = vector.shape_cast %78 : vector<1x4x8x8xf32> to vector<4x8x8xf32>
    %80 = arith.truncf %79 : vector<4x8x8xf32> to vector<4x8x8xbf16>
    "tpu.trace_start"() <{level = 10 : i32, message = "gqd,gkd->gqk"}> : () -> ()
    %cst_20 = arith.constant dense<0.000000e+00> : vector<4x8x8xf32>
    %81 = tpu.matmul %50, %65, %cst_20 {dimension_numbers = #tpu.dot_dimension_numbers<[2], [2], [1], [1], [0, 0, 0, 1, 1, 1], [0], [0]>} : vector<4x8x8xbf16>, vector<4x8x8xbf16>, vector<4x8x8xf32> -> vector<4x8x8xf32>
    "tpu.trace_stop"() : () -> ()
    %cst_21 = arith.constant dense<0xFF800000> : vector<4x8xf32>
    %82 = vector.multi_reduction <maximumf>, %81, %cst_21 [2] : vector<4x8x8xf32> to vector<4x8xf32>
    %83 = vector.shape_cast %82 : vector<4x8xf32> to vector<4x8x1xf32>
    %84 = vector.broadcast %83 : vector<4x8x1xf32> to vector<4x8x8xf32>
    %85 = arith.subf %81, %84 : vector<4x8x8xf32>
    %86 = math.exp %85 : vector<4x8x8xf32>
    %cst_22 = arith.constant dense<0.000000e+00> : vector<4x8xf32>
    %87 = vector.multi_reduction <add>, %86, %cst_22 [2] : vector<4x8x8xf32> to vector<4x8xf32>
    %88 = vector.shape_cast %87 : vector<4x8xf32> to vector<4x8x1xf32>
    %89 = tpu.reciprocal %88 {approx = true} : vector<4x8x1xf32> -> vector<4x8x1xf32>
    %90 = vector.broadcast %89 : vector<4x8x1xf32> to vector<4x8x8xf32>
    %91 = arith.mulf %86, %90 : vector<4x8x8xf32>
    %92 = arith.truncf %91 : vector<4x8x8xf32> to vector<4x8x8xbf16>
    "tpu.trace_start"() <{level = 10 : i32, message = "gqk,gkd->gqd"}> : () -> ()
    %cst_23 = arith.constant dense<0.000000e+00> : vector<4x8x8xf32>
    %93 = tpu.matmul %92, %80, %cst_23 {dimension_numbers = #tpu.dot_dimension_numbers<[2], [1], [1], [2], [0, 0, 0, 1, 1, 2], [0], [0]>} : vector<4x8x8xbf16>, vector<4x8x8xbf16>, vector<4x8x8xf32> -> vector<4x8x8xf32>
    "tpu.trace_stop"() : () -> ()
    %94 = vector.shape_cast %93 : vector<4x8x8xf32> to vector<1x4x8x8xf32>
    %95 = vector.extract_strided_slice %94 {offsets = [0, 0, 0, 0], sizes = [1, 1, 8, 8], strides = [1, 1, 1, 1]} : vector<1x4x8x8xf32> to vector<1x1x8x8xf32>
    %96 = vector.shape_cast %95 : vector<1x1x8x8xf32> to vector<1x8x8xf32>
    %97 = vector.shape_cast %96 : vector<1x8x8xf32> to vector<8x8xf32>
    %98 = vector.extract_strided_slice %94 {offsets = [0, 1, 0, 0], sizes = [1, 1, 8, 8], strides = [1, 1, 1, 1]} : vector<1x4x8x8xf32> to vector<1x1x8x8xf32>
    %99 = vector.shape_cast %98 : vector<1x1x8x8xf32> to vector<1x8x8xf32>
    %100 = vector.shape_cast %99 : vector<1x8x8xf32> to vector<8x8xf32>
    %101 = vector.extract_strided_slice %94 {offsets = [0, 2, 0, 0], sizes = [1, 1, 8, 8], strides = [1, 1, 1, 1]} : vector<1x4x8x8xf32> to vector<1x1x8x8xf32>
    %102 = vector.shape_cast %101 : vector<1x1x8x8xf32> to vector<1x8x8xf32>
    %103 = vector.shape_cast %102 : vector<1x8x8xf32> to vector<8x8xf32>
    %104 = vector.extract_strided_slice %94 {offsets = [0, 3, 0, 0], sizes = [1, 1, 8, 8], strides = [1, 1, 1, 1]} : vector<1x4x8x8xf32> to vector<1x1x8x8xf32>
    %105 = vector.shape_cast %104 : vector<1x1x8x8xf32> to vector<1x8x8xf32>
    %106 = vector.shape_cast %105 : vector<1x8x8xf32> to vector<8x8xf32>
    %107 = tpu.concatenate %97, %100, %103, %106 in 1 : vector<8x8xf32>, vector<8x8xf32>, vector<8x8xf32>, vector<8x8xf32> -> vector<8x32xf32>
    %108 = arith.truncf %107 : vector<8x32xf32> to vector<8x32xbf16>
    %c0_24 = arith.constant 0 : index
    %c0_25 = arith.constant 0 : index
    %109 = vector.load %arg8[%c0_24, %c0_25] : memref<32x32xbf16, #tpu.memory_space<vmem>>, vector<32x32xbf16>
    %cst_26 = arith.constant dense<0.000000e+00> : vector<8x32xf32>
    %110 = tpu.matmul %108, %109, %cst_26 {dimension_numbers = #tpu.dot_dimension_numbers<[1], [0], [0], [1], [0, 0, 1, 1], [], []>} : vector<8x32xbf16>, vector<32x32xbf16>, vector<8x32xf32> -> vector<8x32xf32>
    %c0_27 = arith.constant 0 : index
    %c0_28 = arith.constant 0 : index
    %111 = vector.load %arg9[%c0_27, %c0_28] : memref<1x32xf32, #tpu.memory_space<vmem>>, vector<1x32xf32>
    %112 = vector.broadcast %111 : vector<1x32xf32> to vector<8x32xf32>
    %113 = arith.addf %110, %112 : vector<8x32xf32>
    %114 = arith.addf %5, %113 : vector<8x32xf32>
    %c0_29 = arith.constant 0 : index
    %c0_30 = arith.constant 0 : index
    %115 = vector.load %arg10[%c0_29, %c0_30] : memref<1x32xf32, #tpu.memory_space<vmem>>, vector<1x32xf32>
    %c0_31 = arith.constant 0 : index
    %c0_32 = arith.constant 0 : index
    %116 = vector.load %arg11[%c0_31, %c0_32] : memref<1x32xf32, #tpu.memory_space<vmem>>, vector<1x32xf32>
    %cst_33 = arith.constant dense<0.000000e+00> : vector<8xf32>
    %117 = vector.multi_reduction <add>, %114, %cst_33 [1] : vector<8x32xf32> to vector<8xf32>
    %118 = vector.shape_cast %117 : vector<8xf32> to vector<8x1xf32>
    %cst_34 = arith.constant 3.200000e+01 : f32
    %119 = vector.broadcast %cst_34 : f32 to vector<8x1xf32>
    %120 = arith.divf %118, %119 : vector<8x1xf32>
    %121 = vector.broadcast %120 : vector<8x1xf32> to vector<8x32xf32>
    %122 = arith.subf %114, %121 : vector<8x32xf32>
    %123 = arith.mulf %122, %122 : vector<8x32xf32>
    %cst_35 = arith.constant dense<0.000000e+00> : vector<8xf32>
    %124 = vector.multi_reduction <add>, %123, %cst_35 [1] : vector<8x32xf32> to vector<8xf32>
    %125 = vector.shape_cast %124 : vector<8xf32> to vector<8x1xf32>
    %cst_36 = arith.constant 3.200000e+01 : f32
    %126 = vector.broadcast %cst_36 : f32 to vector<8x1xf32>
    %127 = arith.divf %125, %126 : vector<8x1xf32>
    %128 = vector.broadcast %120 : vector<8x1xf32> to vector<8x32xf32>
    %129 = arith.subf %114, %128 : vector<8x32xf32>
    %cst_37 = arith.constant 9.99999974E-6 : f32
    %130 = vector.broadcast %cst_37 : f32 to vector<8x1xf32>
    %131 = arith.addf %127, %130 : vector<8x1xf32>
    %132 = math.rsqrt %131 : vector<8x1xf32>
    %133 = vector.broadcast %132 : vector<8x1xf32> to vector<8x32xf32>
    %134 = arith.mulf %129, %133 : vector<8x32xf32>
    %135 = vector.broadcast %115 : vector<1x32xf32> to vector<8x32xf32>
    %136 = arith.mulf %134, %135 : vector<8x32xf32>
    %137 = vector.broadcast %116 : vector<1x32xf32> to vector<8x32xf32>
    %138 = arith.addf %136, %137 : vector<8x32xf32>
    %139 = arith.truncf %138 : vector<8x32xf32> to vector<8x32xbf16>
    %c0_38 = arith.constant 0 : index
    %c0_39 = arith.constant 0 : index
    %140 = vector.load %arg12[%c0_38, %c0_39] : memref<32x64xbf16, #tpu.memory_space<vmem>>, vector<32x64xbf16>
    %cst_40 = arith.constant dense<0.000000e+00> : vector<8x64xf32>
    %141 = tpu.matmul %139, %140, %cst_40 {dimension_numbers = #tpu.dot_dimension_numbers<[1], [0], [0], [1], [0, 0, 1, 1], [], []>} : vector<8x32xbf16>, vector<32x64xbf16>, vector<8x64xf32> -> vector<8x64xf32>
    %c0_41 = arith.constant 0 : index
    %c0_42 = arith.constant 0 : index
    %142 = vector.load %arg13[%c0_41, %c0_42] : memref<1x64xf32, #tpu.memory_space<vmem>>, vector<1x64xf32>
    %143 = vector.broadcast %142 : vector<1x64xf32> to vector<8x64xf32>
    %144 = arith.addf %141, %143 : vector<8x64xf32>
    %145 = arith.mulf %144, %144 : vector<8x64xf32>
    %146 = arith.mulf %144, %145 : vector<8x64xf32>
    %cst_43 = arith.constant 4.471500e-02 : f32
    %147 = vector.broadcast %cst_43 : f32 to vector<8x64xf32>
    %148 = arith.mulf %147, %146 : vector<8x64xf32>
    %149 = arith.addf %144, %148 : vector<8x64xf32>
    %cst_44 = arith.constant 0.797884583 : f32
    %150 = vector.broadcast %cst_44 : f32 to vector<8x64xf32>
    %151 = arith.mulf %150, %149 : vector<8x64xf32>
    %152 = math.tanh %151 : vector<8x64xf32>
    %cst_45 = arith.constant 1.000000e+00 : f32
    %153 = vector.broadcast %cst_45 : f32 to vector<8x64xf32>
    %154 = arith.addf %153, %152 : vector<8x64xf32>
    %cst_46 = arith.constant 5.000000e-01 : f32
    %155 = vector.broadcast %cst_46 : f32 to vector<8x64xf32>
    %156 = arith.mulf %155, %154 : vector<8x64xf32>
    %157 = arith.mulf %144, %156 : vector<8x64xf32>
    %158 = arith.truncf %157 : vector<8x64xf32> to vector<8x64xbf16>
    %c0_47 = arith.constant 0 : index
    %c0_48 = arith.constant 0 : index
    %159 = vector.load %arg14[%c0_47, %c0_48] : memref<64x32xbf16, #tpu.memory_space<vmem>>, vector<64x32xbf16>
    %cst_49 = arith.constant dense<0.000000e+00> : vector<8x32xf32>
    %160 = tpu.matmul %158, %159, %cst_49 {dimension_numbers = #tpu.dot_dimension_numbers<[1], [0], [0], [1], [0, 0, 1, 1], [], []>} : vector<8x64xbf16>, vector<64x32xbf16>, vector<8x32xf32> -> vector<8x32xf32>
    %c0_50 = arith.constant 0 : index
    %c0_51 = arith.constant 0 : index
    %161 = vector.load %arg15[%c0_50, %c0_51] : memref<1x32xf32, #tpu.memory_space<vmem>>, vector<1x32xf32>
    %162 = vector.broadcast %161 : vector<1x32xf32> to vector<8x32xf32>
    %163 = arith.addf %160, %162 : vector<8x32xf32>
    %164 = arith.addf %114, %163 : vector<8x32xf32>
    %165 = vector.shape_cast %164 : vector<8x32xf32> to vector<1x8x32xf32>
    %166 = arith.truncf %165 : vector<1x8x32xf32> to vector<1x8x32xbf16>
    %c0_52 = arith.constant 0 : index
    %c0_53 = arith.constant 0 : index
    %c0_54 = arith.constant 0 : index
    %167 = vector.load %arg16[%c0_52, %c0_53, %c0_54] : memref<1x8x32xbf16, #tpu.memory_space<vmem>>, vector<1x8x32xbf16>
    tpu.vector_store %arg16[%c0_52, %c0_53, %c0_54], %166 {strides = array<i32>} : memref<1x8x32xbf16, #tpu.memory_space<vmem>>, vector<1x8x32xbf16>,
    %cst_55 = arith.constant dense<0.000000e+00> : vector<1x32xf32>
    %168 = vector.multi_reduction <add>, %165, %cst_55 [1] : vector<1x8x32xf32> to vector<1x32xf32>
    %169 = vector.shape_cast %168 : vector<1x32xf32> to vector<1x1x32xf32>
    %cst_56 = arith.constant 8.000000e+00 : f32
    %170 = vector.broadcast %cst_56 : f32 to vector<1x1x32xf32>
    %171 = arith.divf %169, %170 : vector<1x1x32xf32>
    %c0_57 = arith.constant 0 : index
    %c0_58 = arith.constant 0 : index
    %c0_59 = arith.constant 0 : index
    %172 = vector.load %arg17[%c0_57, %c0_58, %c0_59] : memref<1x1x32xf32, #tpu.memory_space<vmem>>, vector<1x1x32xf32>
    tpu.vector_store %arg17[%c0_57, %c0_58, %c0_59], %171 {strides = array<i32>} : memref<1x1x32xf32, #tpu.memory_space<vmem>>, vector<1x1x32xf32>,
    return
  }
  func.func @transform_0(%arg0: i32) -> (i32, i32, i32) {
    %c0_i32 = arith.constant 0 : i32
    %c0_i32_0 = arith.constant 0 : i32
    %c0_i32_1 = arith.constant 0 : i32
    return %arg0, %c0_i32, %c0_i32_0 : i32, i32, i32
  }
  func.func @transform_1(%arg0: i32) -> (i32, i32) {
    %c0_i32 = arith.constant 0 : i32
    %c0_i32_0 = arith.constant 0 : i32
    %c0_i32_1 = arith.constant 0 : i32
    return %c0_i32, %c0_i32_0 : i32, i32
  }
  func.func @transform_2(%arg0: i32) -> (i32, i32) {
    %c0_i32 = arith.constant 0 : i32
    %c0_i32_0 = arith.constant 0 : i32
    %c0_i32_1 = arith.constant 0 : i32
    return %c0_i32, %c0_i32_0 : i32, i32
  }
  func.func @transform_3(%arg0: i32) -> (i32, i32) {
    %c0_i32 = arith.constant 0 : i32
    %c0_i32_0 = arith.constant 0 : i32
    %c0_i32_1 = arith.constant 0 : i32
    return %c0_i32, %c0_i32_0 : i32, i32
  }
  func.func @transform_4(%arg0: i32) -> (i32, i32) {
    %c0_i32 = arith.constant 0 : i32
    %c0_i32_0 = arith.constant 0 : i32
    %c0_i32_1 = arith.constant 0 : i32
    return %c0_i32, %c0_i32_0 : i32, i32
  }
  func.func @transform_5(%arg0: i32) -> (i32, i32) {
    %c0_i32 = arith.constant 0 : i32
    %c0_i32_0 = arith.constant 0 : i32
    %c0_i32_1 = arith.constant 0 : i32
    return %c0_i32, %c0_i32_0 : i32, i32
  }
  func.func @transform_6(%arg0: i32) -> (i32, i32) {
    %c0_i32 = arith.constant 0 : i32
    %c0_i32_0 = arith.constant 0 : i32
    %c0_i32_1 = arith.constant 0 : i32
    return %c0_i32, %c0_i32_0 : i32, i32
  }
  func.func @transform_7(%arg0: i32) -> (i32, i32) {
    %c0_i32 = arith.constant 0 : i32
    %c0_i32_0 = arith.constant 0 : i32
    %c0_i32_1 = arith.constant 0 : i32
    return %c0_i32, %c0_i32_0 : i32, i32
  }
  func.func @transform_8(%arg0: i32) -> (i32, i32) {
    %c0_i32 = arith.constant 0 : i32
    %c0_i32_0 = arith.constant 0 : i32
    %c0_i32_1 = arith.constant 0 : i32
    return %c0_i32, %c0_i32_0 : i32, i32
  }
  func.func @transform_9(%arg0: i32) -> (i32, i32) {
    %c0_i32 = arith.constant 0 : i32
    %c0_i32_0 = arith.constant 0 : i32
    %c0_i32_1 = arith.constant 0 : i32
    return %c0_i32, %c0_i32_0 : i32, i32
  }
  func.func @transform_10(%arg0: i32) -> (i32, i32) {
    %c0_i32 = arith.constant 0 : i32
    %c0_i32_0 = arith.constant 0 : i32
    %c0_i32_1 = arith.constant 0 : i32
    return %c0_i32, %c0_i32_0 : i32, i32
  }
  func.func @transform_11(%arg0: i32) -> (i32, i32) {
    %c0_i32 = arith.constant 0 : i32
    %c0_i32_0 = arith.constant 0 : i32
    %c0_i32_1 = arith.constant 0 : i32
    return %c0_i32, %c0_i32_0 : i32, i32
  }
  func.func @transform_12(%arg0: i32) -> (i32, i32) {
    %c0_i32 = arith.constant 0 : i32
    %c0_i32_0 = arith.constant 0 : i32
    %c0_i32_1 = arith.constant 0 : i32
    return %c0_i32, %c0_i32_0 : i32, i32
  }
  func.func @transform_13(%arg0: i32) -> (i32, i32) {
    %c0_i32 = arith.constant 0 : i32
    %c0_i32_0 = arith.constant 0 : i32
    %c0_i32_1 = arith.constant 0 : i32
    return %c0_i32, %c0_i32_0 : i32, i32
  }
  func.func @transform_14(%arg0: i32) -> (i32, i32) {
    %c0_i32 = arith.constant 0 : i32
    %c0_i32_0 = arith.constant 0 : i32
    %c0_i32_1 = arith.constant 0 : i32
    return %c0_i32, %c0_i32_0 : i32, i32
  }
  func.func @transform_15(%arg0: i32) -> (i32, i32, i32) {
    %c0_i32 = arith.constant 0 : i32
    %c0_i32_0 = arith.constant 0 : i32
    %c0_i32_1 = arith.constant 0 : i32
    return %arg0, %c0_i32, %c0_i32_0 : i32, i32, i32
  }
  func.func @transform_16(%arg0: i32) -> (i32, i32, i32) {
    %c0_i32 = arith.constant 0 : i32
    %c0_i32_0 = arith.constant 0 : i32
    %c0_i32_1 = arith.constant 0 : i32
    return %arg0, %c0_i32, %c0_i32_0 : i32, i32, i32
  }
}

</mosaic_0001>

<bundles_post_ra>
// kernel: mlae_apply.1
= control target key start
LH: loop header
LB: loop body
LE: loop exit
PB: predicated region body
PF: predicated region fallthrough
CT: control target
= control target key end

     0   :  { %s2285_s0 = inlined_call_operand.vmem [shape: bf16[2,8,32], index: 0, kind: input, shape index: {}]   ;;  %s2286_s1 = inlined_call_operand.vmem [shape: bf16[32,32], index: 1, kind: input, shape index: {}]   ;;  %s2287_s2 = inlined_call_operand.vmem [shape: f32[8,32], index: 2, kind: input, shape index: {}]   ;;  %s2288_s3 = inlined_call_operand.vmem [shape: f32[1,32], index: 3, kind: input, shape index: {}]   ;;  %s2289_s4 = inlined_call_operand.vmem [shape: f32[1,32], index: 4, kind: input, shape index: {}]   ;;  %s2290_s5 = inlined_call_operand.vmem [shape: bf16[32,96], index: 5, kind: input, shape index: {}]   ;;  %s2291_s6 = inlined_call_operand.vmem [shape: f32[1,96], index: 6, kind: input, shape index: {}]   ;;  %s2292_s7 = inlined_call_operand.vmem [shape: bf16[32,32], index: 7, kind: input, shape index: {}]   ;;  %s2293_s8 = inlined_call_operand.vmem [shape: f32[1,32], index: 8, kind: input, shape index: {}]   ;;  %s2294_s9 = inlined_call_operand.vmem [shape: f32[1,32], index: 9, kind: input, shape index: {}]   ;;  %s2295_s10 = inlined_call_operand.vmem [shape: f32[1,32], index: 10, kind: input, shape index: {}]   ;;  %s2296_s11 = inlined_call_operand.vmem [shape: bf16[32,64], index: 11, kind: input, shape index: {}]   ;;  %s2297_s12 = inlined_call_operand.vmem [shape: f32[1,64], index: 12, kind: input, shape index: {}]   ;;  %s2298_s13 = inlined_call_operand.vmem [shape: bf16[64,32], index: 13, kind: input, shape index: {}]   ;;  %s2299_s14 = inlined_call_operand.vmem [shape: f32[1,32], index: 14, kind: input, shape index: {}]   ;;  %s2300_s15 = inlined_call_operand.hbm [shape: bf16[2,8,32], index: 15, kind: output, shape index: {0}]   ;;  %s2301_s16 = inlined_call_operand.hbm [shape: f32[2,1,32], index: 16, kind: output, shape index: {1}]  }
   0x1   :  { %2303 = sst [smem:[#allocation10_spill]] %s2285_s0 }
   0x2   :  { %2304 = sst [smem:[#allocation11_spill]] %s2286_s1 }
   0x3   :  { %2305 = sst [smem:[#allocation12_spill]] %s2287_s2 }
   0x4   :  { %2306 = sst [smem:[#allocation13_spill]] %s2288_s3 }
   0x5   :  { %2307 = sst [smem:[#allocation14_spill]] %s2289_s4 }
   0x6   :  { %2308 = sst [smem:[#allocation15_spill]] %s2290_s5 }
   0x7   :  { %22 = vsyncpa [#allocation3], 0 }
   0x8   :  { %24 = vsyncpa [#allocation3 + $0x1], 0 }
   0x9   :  { %25 = vsyncpa [#allocation5], 0 }
   0xa   :  { %27 = vsyncpa [#allocation5 + $0x1], 0  ;;  %s1992_s21 = smov 0   ;;  %s1994_s22 = smov 0  }
   0xb   :  { %s1996_s23 = smov 0   ;;  %s1998_s24 = smov 0  }
   0xc LB: > { %2309 = sst [smem:[#allocation8_spill]] %s1889_s23  ;;  %s2013_s25 = sadd.s32 4294967295, %s1893_s24   ;;  %s1893_s24 = sphi %s1998_s24, %s2323_s24   ;;  %s1889_s23 = sphi %s1996_s23, %s2320_s23   ;;  %s1885_s22 = sphi %s1994_s22, %s2322_s22   ;;  %s1881_s21 = sphi %s1992_s21, %s2321_s21  }
   0xd   : > { %s1546_s26 = sadd.s32 4294967294, %s1893_s24   ;;  %s2017_s27 = sadd.s32 1, %s1893_s24  }
   0xe   : > { %s360_s28 = sadd.s32 1, %s1889_s23  ;;  %s357_s29 = ssub.s32 %s1893_s24, %s2017_s27 }
   0xf   : > { %p370_p0 = scmp.ne.s32.totalorder %s1889_s23, %s1885_s22  ;;  %p358_p1 = scmp.eq.s32.totalorder %s357_s29, 0 }
  0x10   : > { %p371_p2 = scmp.eq.s32.totalorder %s2013_s25, 1  ;;  %p376_p3 = scmp.ne.s32.totalorder %s1885_s22, %s1881_s21 }
  0x11   : > { %p377_p4 = scmp.eq.s32.totalorder %s1546_s26, 1  ;;  %p1549_p7 = scmp.ge.s32.totalorder %s1893_s24, 1 }
  0x12   : > { %s2028_s30 = scalar_select %p358_p1, %s1889_s23, %s360_s28  }
  0x13   : > { %p2030_p5 = por %p371_p2, %p370_p0  ;;  %p2034_p6 = por %p377_p4, %p376_p3 }
  0x14   : > { %2310 = sst [smem:[#allocation9_spill]] %s2028_s30  ;;  %p470_p8 = scmp.lt.s32.totalorder %s1893_s24, 3 }
  0x16   : > { %p471_p9 = pnand %p1549_p7, %p470_p8 }
  0x17   : > { %s2313_s1 = sld [smem:[#allocation11_spill]] (!%p471_p9)  ;;  %p523_p10 = scmp.lt.s32.totalorder (!%p471_p9), %s2013_s25, 1 }
  0x18   : > { %474 = sbr.rel (%p471_p9) target bundleno = 2775 (0xad7), region = 80  ;;  %s2314_s30 = sld [smem:[#allocation10_spill]] (!%p471_p9) }
  0x19   : > { %s2315_s2 = sld [smem:[#allocation12_spill]] (!%p471_p9)  ;;  %s1899_s18 = smov (!%p471_p9), 112  }
  0x1a   : > { %s2316_s5 = sld [smem:[#allocation15_spill]] (!%p471_p9)  ;;  %s1900_s19 = smov (!%p471_p9), 96  }
  0x1b   : > { %s2317_s3 = sld [smem:[#allocation13_spill]] (!%p471_p9)  ;;  %s1901_s20 = smov (!%p471_p9), 64  }
  0x1c   : > { %s2318_s4 = sld [smem:[#allocation14_spill]] (!%p471_p9) }
  0x1d   : > { %v1769_v0 = vld [vmem:[%s2313_s1 + $0x8] sm:$0xff]   ;;  %v1895_v1 = vmov 0.0   ;;  %v1770_v2 = vld [vmem:[%s2313_s1] sm:$0xff]   ;;  %vm1896_vm0 = vmmov 0   ;;  %s524_s28 = scalar_select %p523_p10, %s2013_s25, 1  ;;  %vm546_vm1 = vcmask 261120  }
  0x1e   : > { %1623 = vmatprep.subr.bf16.mxu1 %v1895_v1  ;;  %1639 = vmatprep.subr.bf16.mxu0 %v1895_v1  ;;  %v1557_v28 = vld [vmem:[%s2291_s6] ss:$0 sm:$0xff]  ;;  %vm704_vm2 = vcmask 64512   ;;  %vm951_vm3 = vcmask 1043456   ;;  %vm1152_vm4 = vcmask 130048   ;;  %vm1154_vm5 = vcmask 195584  }
  0x1f   : > { %1624 = vmatpush3.bf16.msra.mxu1 %v1769_v0  ;;  %1627 = vmatprep.mubr.msk.bf16.mxu1 %vm1896_vm0, %v1895_v1  ;;  %s1551_s29 = sshll.u32 %s524_s28, 2  ;;  %v533_v4 = vld [vmem:[%s2315_s2] sm:$0xff]  ;;  %s1897_s28 = smov 104   ;;  %vm1369_vm6 = vcmask 523264   ;;  %vm1415_vm7 = vcmask 257024  }
  0x20   : > { %1625 = vmatprep.subr.bf16.mxu1 %v1895_v1  ;;  %1641 = vmatprep.mubr.msk.bf16.mxu0 %vm1896_vm0, %v1895_v1  ;;  %s526_s23 = scalar_lea.vmem %s2314_s30, %s1551_s29  ;;  %v1771_v16 = vld [vmem:[%s2316_s5 + $0x8] sm:$0xff]   ;;  %v1772_v17 = vld [vmem:[%s2316_s5] sm:$0xff]   ;;  %s1898_s29 = smov 120  }
  0x21   : > { %v528_v3 = vld [vmem:[%s526_s23] sm:$0xf]  ;;  %s1905_s2 = smov [#allocation2]  }
  0x22   : > { %v1555_v22 = vld [vmem:[%s2317_s3] ss:$0 sm:$0xff]  ;;  %s1807_s3 = sshll.u32 %s1905_s2, 4  ;;  %s1808_s3 = int_to_ptr.vmem [resolvable:$false] %s1807_s3 }
  0x23   : > { %1626 = vmatpush3.bf16.msra.mxu1 %v1770_v2  ;;  %v1556_v24 = vld [vmem:[%s2318_s4] ss:$0 sm:$0xff] }
  0x24   : > { %1631 = vmatprep.subr.bf16.mxu1 %v1895_v1 }
  0x26   : > { %1628 = vmatmul.mubr.msk.bf16.vlgmr.msra.gmra.mxu1 %vm546_vm1, %v528_v3 }
  0x27   : > { %1635 = vmatprep.mubr.msk.bf16.mxu1 %vm1896_vm0, %v1895_v1  ;;  %1632 = vmatpush3.bf16.msra.mxu1 %v1771_v16 }
  0x28   : > { %1633 = vmatprep.subr.bf16.mxu1 %v1895_v1 }
  0x2b   : > { %1634 = vmatpush3.bf16.msra.mxu1 %v1772_v17 }
  0x2c   : > { %1645 = vmatprep.subr.bf16.mxu1 %v1895_v1 }
  0xe6   : > { %v584_v5 = vpop.f32.mrf.mxu1 }
  0xe7   : > { %v2065_v6 = vadd.f32 %v584_v5, %v533_v4 }
  0xe8   : > { %v1629_v7 = vpop.f32.mrf.mxu1 }
  0xe9   : > { %v592_v8 = vsel %vm546_vm1, %v2065_v6, 0.0 }
  0xea   : > { %593 = vadd.xlane.f32.xlu0 %v592_v8  ;;  %v587_v9 = vpop.f32.mrf.mxu1 }
  0xec   : > { %v1630_v10 = vpop.f32.mrf.mxu1 }
 0x173   : > { %v594_v11 = vpop.xlane.xlu0 %593 }
 0x174   : > { %v596_v12 = vmul.f32 0.03125, %v594_v11 }
 0x176   : > { %v597_v13 = vsub.f32 %v2065_v6, %v596_v12 }
 0x178   : > { %v598_v14 = vmul.f32 %v597_v13, %v597_v13 }
 0x17a   : > { %v599_v15 = vsel %vm546_vm1, %v598_v14, 0.0 }
 0x17b   : > { %600 = vadd.xlane.f32.xlu0 %v599_v15 }
 0x204   : > { %v601_v18 = vpop.xlane.xlu0 %600 }
 0x205   : > { %v602_v19 = vmul.f32 0.03125, %v601_v18 }
 0x207   : > { %v603_v20 = vadd.f32 1e-05, %v602_v19 }
 0x209   : > { %1781 = vrsqrt.f32 %v603_v20 }
 0x216   : > { %v1782_v21 = vpop.eup %1781 }
 0x217   : > { %v605_v23 = vmul.f32 %v1782_v21, %v597_v13 }
 0x219   : > { %v612_v25 = vmul.f32 %v1555_v22, %v605_v23 }
 0x21b   : > { %v619_v26 = vadd.f32 %v1556_v24, %v612_v25 }
 0x21d   : > { %v620_v27 = vpack.c.bf16 %v619_v26, %v619_v26 }
 0x21f   : > { %1636 = vmatmul.mubr.msk.bf16.vlgmr.msra.gmra.mxu1 %vm546_vm1, %v620_v27 }
 0x220   : > { %1647 = vmatprep.mubr.msk.bf16.mxu1 %vm1896_vm0, %v1895_v1 }
 0x2df   : > { %v681_v29 = vpop.f32.mrf.mxu1 }
 0x2e0   : > { %v682_v30 = vadd.f32 %v1557_v28, %v681_v29 }
 0x2e1   : > { %v1637_v31 = vpop.f32.mrf.mxu1 }
 0x2e2   : > { %694 = vrot.lane.b32.xlu0 %v682_v30, %s1897_s28  ;;  %688 = vrot.lane.b32.xlu1 %v682_v30, %s1898_s29  ;;  %v697_v34 = vpack.c.bf16 %v682_v30, %v682_v30  ;;  %s1902_s29 = smov 8   ;;  %s2213_s28 = sand.u32 1, %s1885_s22  }
 0x2e3   : > { %v684_v32 = vpop.f32.mrf.mxu1 }
 0x2e5   : > { %v1638_v33 = vpop.f32.mrf.mxu1 }
 0x2e6   : > { %691 = vrot.lane.b32.xlu1 %v682_v30, %s1899_s18  ;;  %s1903_s18 = smov 16  }
 0x2ea   : > { %702 = vrot.lane.b32.xlu1 %v697_v34, %s1900_s19 }
 0x354   : > { %v689_v35 = vpop.permute.xlu1 %688  ;;  %v695_v39 = vpop.permute.xlu0 %694 }
 0x355   : > { %v2091_v36 = vpack.c.bf16 %v689_v35, %v689_v35  ;;  %v2097_v41 = vpack.c.bf16 %v695_v39, %v695_v39 }
 0x357   : > { %752 = vrot.lane.b32.xlu1 %v2091_v36, %s1900_s19 }
 0x358   : > { %v692_v37 = vpop.permute.xlu1 %691 }
 0x359   : > { %v2094_v38 = vpack.c.bf16 %v692_v37, %v692_v37 }
 0x35b   : > { %801 = vrot.lane.b32.xlu1 %v2094_v38, %s1900_s19 }
 0x35c   : > { %v703_v40 = vpop.permute.xlu1 %702 }
 0x35d   : > { %v709_v42 = vsel %vm704_vm2, %v703_v40, 0 }
 0x35e   : > { %1640 = vmatpush3.bf16.xpose.msra.mxu0 %v709_v42 }
 0x35f   : > { %850 = vrot.lane.b32.xlu1 %v2097_v41, %s1900_s19  ;;  %1651 = vmatprep.subr.bf16.mxu0 %v1895_v1  ;;  %s1904_s19 = smov 24  }
 0x365   : > { %1642 = vmatmul.mubr.msk.bf16.vlgmr.msra.gmra.mxu0 %vm704_vm2, %v697_v34 }
 0x366   : > { %1653 = vmatprep.mubr.msk.bf16.mxu0 %vm1896_vm0, %v1895_v1 }
 0x3c9   : > { %v753_v43 = vpop.permute.xlu1 %752 }
 0x3ca   : > { %v758_v44 = vsel %vm704_vm2, %v753_v43, 0 }
 0x3cb   : > { %1646 = vmatpush3.bf16.xpose.msra.mxu1 %v758_v44 }
 0x3cc   : > { %1657 = vmatprep.subr.bf16.mxu1 %v1895_v1 }
 0x3cd   : > { %v802_v45 = vpop.permute.xlu1 %801 }
 0x3ce   : > { %v807_v46 = vsel %vm704_vm2, %v802_v45, 0 }
 0x3cf   : > { %1652 = vmatpush3.bf16.xpose.msra.mxu0 %v807_v46 }
 0x3d0   : > { %1663 = vmatprep.subr.bf16.mxu0 %v1895_v1 }
 0x3d1   : > { %v851_v47 = vpop.permute.xlu1 %850 }
 0x3d2   : > { %v856_v48 = vsel %vm704_vm2, %v851_v47, 0  ;;  %1648 = vmatmul.mubr.msk.bf16.vlgmr.msra.gmra.mxu1 %vm704_vm2, %v2091_v36 }
 0x3d3   : > { %1658 = vmatpush3.bf16.xpose.msra.mxu1 %v856_v48  ;;  %1659 = vmatprep.mubr.msk.bf16.mxu1 %vm1896_vm0, %v1895_v1 }
 0x3d4   : > { %1669 = vmatprep.subr.bf16.mxu1 %v1895_v1 }
 0x3d6   : > { %1654 = vmatmul.mubr.msk.bf16.vlgmr.msra.gmra.mxu0 %vm704_vm2, %v2094_v38 }
 0x3d7   : > { %1665 = vmatprep.mubr.msk.bf16.mxu0 %vm1896_vm0, %v1895_v1 }
 0x3da   : > { %1660 = vmatmul.mubr.msk.bf16.vlgmr.msra.gmra.mxu1 %vm704_vm2, %v2097_v41 }
 0x3db   : > { %1671 = vmatprep.mubr.msk.bf16.mxu1 %vm1896_vm0, %v1895_v1 }
 0x425   : > { %v745_v49 = vpop.f32.mrf.mxu0 }
 0x426   : > { %v898_v50 = vsel %vm704_vm2, %v745_v49, -inf }
 0x427   : > { %899 = vmax.xlane.f32.xlu1 %v898_v50  ;;  %v1643_v51 = vpop.f32.mrf.mxu0 }
 0x429   : > { %v748_v52 = vpop.f32.mrf.mxu0 }
 0x42b   : > { %v1644_v53 = vpop.f32.mrf.mxu0 }
 0x492   : > { %v794_v54 = vpop.f32.mrf.mxu1 }
 0x493   : > { %v901_v55 = vsel %vm704_vm2, %v794_v54, -inf }
 0x494   : > { %902 = vmax.xlane.f32.xlu0 %v901_v55  ;;  %v1649_v56 = vpop.f32.mrf.mxu1  ;;  %v1773_v55 = vld [vmem:[%s2292_s7 + $0x8] sm:$0xff]  }
 0x495   : > { %v1774_v56 = vld [vmem:[%s2292_s7] sm:$0xff]  }
 0x496   : > { %v797_v57 = vpop.f32.mrf.mxu1  ;;  %v843_v58 = vpop.f32.mrf.mxu0 }
 0x497   : > { %v904_v59 = vsel %vm704_vm2, %v843_v58, -inf }
 0x498   : > { %905 = vmax.xlane.f32.xlu1 %v904_v59  ;;  %v1650_v60 = vpop.f32.mrf.mxu1  ;;  %v1655_v61 = vpop.f32.mrf.mxu0 }
 0x49a   : > { %v846_v62 = vpop.f32.mrf.mxu0  ;;  %v892_v63 = vpop.f32.mrf.mxu1 }
 0x49b   : > { %v907_v0 = vsel %vm704_vm2, %v892_v63, -inf }
 0x49c   : > { %v1656_v2 = vpop.f32.mrf.mxu0  ;;  %908 = vmax.xlane.f32.xlu0 %v907_v0  ;;  %v1661_v3 = vpop.f32.mrf.mxu1 }
 0x49e   : > { %v895_v4 = vpop.f32.mrf.mxu1 }
 0x4a0   : > { %v1662_v5 = vpop.f32.mrf.mxu1 }
 0x4a9   : > { %946 = vrot.lane.b32.xlu1 %v697_v34, %s1901_s20 }
 0x4b0   : > { %v900_v7 = vpop.xlane.xlu1 %899 }
 0x4b1   : > { %v910_v8 = vsub.f32 %v745_v49, %v900_v7 }
 0x4b3   : > { %v914_v9 = vmul.f32 1.442695, %v910_v8 }
 0x4b5   : > { %1783 = vpow2.f32 %v914_v9 }
 0x4c2   : > { %v1784_v10 = vpop.eup %1783 }
 0x4c3   : > { %v922_v11 = vsel %vm704_vm2, %v1784_v10, 0.0 }
 0x4cd   : > { %923 = vadd.xlane.f32.xlu1 %v922_v11 }
 0x51d   : > { %v903_v12 = vpop.xlane.xlu0 %902 }
 0x51e   : > { %v911_v13 = vsub.f32 %v794_v54, %v903_v12 }
 0x520   : > { %v916_v14 = vmul.f32 1.442695, %v911_v13 }
 0x521   : > { %v906_v15 = vpop.xlane.xlu1 %905 }
 0x522   : > { %1785 = vpow2.f32 %v916_v14  ;;  %v912_v16 = vsub.f32 %v843_v58, %v906_v15  ;;  %v1569_v14 = vld [vmem:[%s2293_s8] ss:$0 sm:$0xff] }
 0x524   : > { %v918_v17 = vmul.f32 1.442695, %v912_v16 }
 0x525   : > { %v947_v18 = vpop.permute.xlu1 %946  ;;  %v909_v19 = vpop.xlane.xlu0 %908 }
 0x526   : > { %1787 = vpow2.f32 %v918_v17  ;;  %v953_v20 = vsel %vm951_vm3, %v947_v18, 0  ;;  %v913_v21 = vsub.f32 %v892_v63, %v909_v19 }
 0x527   : > { %1664 = vmatpush3.bf16.msra.mxu0 %v953_v20 }
 0x528   : > { %v920_v22 = vmul.f32 1.442695, %v913_v21  ;;  %1675 = vmatprep.subr.bf16.mxu0 %v1895_v1 }
 0x52a   : > { %1789 = vpow2.f32 %v920_v22 }
 0x52f   : > { %v1786_v23 = vpop.eup %1785 }
 0x530   : > { %v925_v24 = vsel %vm704_vm2, %v1786_v23, 0.0 }
 0x531   : > { %926 = vadd.xlane.f32.xlu0 %v925_v24 }
 0x533   : > { %v1788_v25 = vpop.eup %1787 }
 0x534   : > { %v928_v26 = vsel %vm704_vm2, %v1788_v25, 0.0 }
 0x535   : > { %929 = vadd.xlane.f32.xlu1 %v928_v26 }
 0x537   : > { %v1790_v27 = vpop.eup %1789 }
 0x538   : > { %v931_v28 = vsel %vm704_vm2, %v1790_v27, 0.0 }
 0x539   : > { %932 = vadd.xlane.f32.xlu0 %v931_v28 }
 0x546   : > { %1043 = vrot.lane.b32.xlu1 %v2094_v38, %s1901_s20 }
 0x54a   : > { %1091 = vrot.lane.b32.xlu1 %v2097_v41, %s1901_s20 }
 0x54f   : > { %995 = vrot.lane.b32.xlu0 %v2091_v36, %s1901_s20  ;;  %s1586_s20 = sshll.u32 %s2013_s25, 6 }
 0x556   : > { %v924_v29 = vpop.xlane.xlu1 %923 }
 0x557   : > { %1791 = vrcp.f32 %v924_v29 }
 0x564   : > { %v1792_v30 = vpop.eup %1791 }
 0x565   : > { %v938_v31 = vmul.f32 %v1792_v30, %v1784_v10 }
 0x567   : > { %v942_v32 = vpack.c.bf16 %v938_v31, %v938_v31 }
 0x569   : > { %1666 = vmatmul.mubr.msk.bf16.vlgmr.msra.gmra.mxu0 %vm704_vm2, %v942_v32  ;;  %v1573_v32 = vld [vmem:[%s2294_s9] ss:$0 sm:$0xff] }
 0x56a   : > { %1677 = vmatprep.mubr.msk.bf16.mxu0 %vm1896_vm0, %v1895_v1 }
 0x5ba   : > { %v927_v33 = vpop.xlane.xlu0 %926 }
 0x5bb   : > { %1793 = vrcp.f32 %v927_v33 }
 0x5be   : > { %v930_v34 = vpop.xlane.xlu1 %929 }
 0x5bf   : > { %1795 = vrcp.f32 %v930_v34  ;;  %v1574_v34 = vld [vmem:[%s2295_s10] ss:$0 sm:$0xff] }
 0x5c2   : > { %v1044_v35 = vpop.permute.xlu1 %1043  ;;  %v933_v37 = vpop.xlane.xlu0 %932 }
 0x5c3   : > { %v1049_v38 = vsel %vm951_vm3, %v1044_v35, 0  ;;  %1797 = vrcp.f32 %v933_v37 }
 0x5c4   : > { %1676 = vmatpush3.bf16.msra.mxu0 %v1049_v38 }
 0x5c5   : > { %1687 = vmatprep.subr.bf16.mxu0 %v1895_v1 }
 0x5c6   : > { %v996_v36 = vpop.permute.xlu0 %995  ;;  %v1092_v42 = vpop.permute.xlu1 %1091 }
 0x5c7   : > { %v1001_v39 = vsel %vm951_vm3, %v996_v36, 0  ;;  %v1097_v45 = vsel %vm951_vm3, %v1092_v42, 0  ;;  %v1777_v36 = vld [vmem:[%s2298_s13 + $0x18] sm:$0xff]   ;;  %v1575_v42 = vld [vmem:[%s2297_s12] ss:$0 sm:$0xff] }
 0x5c8   : > { %v1794_v40 = vpop.eup %1793  ;;  %1670 = vmatpush3.bf16.msra.mxu1 %v1001_v39  ;;  %v1778_v39 = vld [vmem:[%s2298_s13 + $0x10] sm:$0xff]  }
 0x5c9   : > { %1681 = vmatprep.subr.bf16.mxu1 %v1895_v1  ;;  %v939_v41 = vmul.f32 %v1794_v40, %v1786_v23  ;;  %v1779_v40 = vld [vmem:[%s2298_s13 + $0x8] sm:$0xff]  }
 0x5cb   : > { %v943_v43 = vpack.c.bf16 %v939_v41, %v939_v41  ;;  %v1780_v41 = vld [vmem:[%s2298_s13] sm:$0xff]  }
 0x5cc   : > { %v1796_v44 = vpop.eup %1795 }
 0x5cd   : > { %1672 = vmatmul.mubr.msk.bf16.vlgmr.msra.gmra.mxu1 %vm704_vm2, %v943_v43  ;;  %v940_v46 = vmul.f32 %v1796_v44, %v1788_v25 }
 0x5ce   : > { %1682 = vmatpush3.bf16.msra.mxu1 %v1097_v45  ;;  %1683 = vmatprep.mubr.msk.bf16.mxu1 %vm1896_vm0, %v1895_v1 }
 0x5cf   : > { %v944_v47 = vpack.c.bf16 %v940_v46, %v940_v46  ;;  %1695 = vmatprep.subr.bf16.mxu1 %v1895_v1 }
 0x5d0   : > { %v1798_v48 = vpop.eup %1797 }
 0x5d1   : > { %1678 = vmatmul.mubr.msk.bf16.vlgmr.msra.gmra.mxu0 %vm704_vm2, %v944_v47  ;;  %v941_v49 = vmul.f32 %v1798_v48, %v1790_v27  ;;  %v1775_v27 = vld [vmem:[%s2296_s11 + $0x8] sm:$0xff]  }
 0x5d2   : > { %1691 = vmatprep.mubr.msk.bf16.mxu0 %vm1896_vm0, %v1895_v1  ;;  %1688 = vmatpush3.bf16.msra.mxu0 %v1773_v55 }
 0x5d3   : > { %v945_v50 = vpack.c.bf16 %v941_v49, %v941_v49  ;;  %1689 = vmatprep.subr.bf16.mxu0 %v1895_v1 }
 0x5d5   : > { %1684 = vmatmul.mubr.msk.bf16.vlgmr.msra.gmra.mxu1 %vm704_vm2, %v945_v50 }
 0x5d6   : > { %1699 = vmatprep.mubr.msk.bf16.mxu1 %vm1896_vm0, %v1895_v1  ;;  %1690 = vmatpush3.bf16.msra.mxu0 %v1774_v56 }
 0x5d7   : > { %1703 = vmatprep.subr.bf16.mxu0 %v1895_v1  ;;  %1696 = vmatpush3.bf16.msra.mxu1 %v1775_v27 }
 0x5d8   : > { %1697 = vmatprep.subr.bf16.mxu1 %v1895_v1 }
 0x629   : > { %v989_v51 = vpop.f32.mrf.mxu0 }
 0x62b   : > { %v1667_v52 = vpop.f32.mrf.mxu0 }
 0x62d   : > { %v992_v53 = vpop.f32.mrf.mxu0 }
 0x62f   : > { %v1668_v54 = vpop.f32.mrf.mxu0 }
 0x68d   : > { %v1037_v57 = vpop.f32.mrf.mxu1 }
 0x68e   : > { %1140 = vrot.lane.b32.xlu0 %v1037_v57, %s1902_s29  ;;  %v1579_v57 = vld [vmem:[%s2299_s14] ss:$0 sm:$0xff] }
 0x68f   : > { %v1673_v58 = vpop.f32.mrf.mxu1 }
 0x691   : > { %v1040_v59 = vpop.f32.mrf.mxu1  ;;  %v1085_v60 = vpop.f32.mrf.mxu0 }
 0x692   : > { %1144 = vrot.lane.b32.xlu1 %v1085_v60, %s1903_s18  ;;  %s2225_s18 = scalar_lea.hbm %s2300_s15, %s1586_s20  ;;  %s1809_s20 = scalar_lea.vmem %s1808_s3, 128 }
 0x693   : > { %v1674_v61 = vpop.f32.mrf.mxu1  ;;  %v1679_v62 = vpop.f32.mrf.mxu0 }
 0x695   : > { %v1088_v63 = vpop.f32.mrf.mxu0  ;;  %v1133_v0 = vpop.f32.mrf.mxu1 }
 0x696   : > { %1148 = vrot.lane.b32.xlu0 %v1133_v0, %s1904_s19  ;;  %s1550_s19 = sshll.u32 %s2213_s28, 2 }
 0x697   : > { %v1680_v2 = vpop.f32.mrf.mxu0  ;;  %v1685_v3 = vpop.f32.mrf.mxu1  ;;  %s516_s26 = scalar_lea.vmem [#allocation2], %s1550_s19  ;;  %s1429_s19 = scalar_lea.sflag [#allocation3], %s2213_s28 }
 0x698   : > { %s1446_s23 = sshll.u32 %s516_s26, 4  ;;  %s2227_s23 = int_to_ptr.vmem [resolvable:$true] %s1446_s23 }
 0x699   : > { %v1136_v4 = vpop.f32.mrf.mxu1  ;;  %s1803_s1 = scalar_lea.vmem %s2227_s23, 64  ;;  %p1810_p0 = scmp.lt.s32.totalorder %s2227_s23, %s1808_s3 }
 0x69a   : > { %p1804_p11 = scmp.ne.s32.totalorder %s2227_s23, %s1803_s1  ;;  %p1811_p1 = scmp.lt.s32.totalorder %s1809_s20, %s1803_s1 }
 0x69b   : > { %v1686_v5 = vpop.f32.mrf.mxu1 }
 0x69c   : > { %p1805_p12 = pnand %p1804_p11, %p2030_p5  ;;  %p1812_p2 = por %p1811_p1, %p1810_p0 }
 0x69e   : > { %p1806_p13 = pneg %p1805_p12 }
 0x6a0   : > { %p1813_p3 = pnand %p1812_p2, %p1806_p13 }
 0x700   : > { %v1141_v7 = vpop.permute.xlu0 %1140 }
 0x701   : > { %v1151_v9 = vsel %vm704_vm2, %v989_v51, %v1141_v7 }
 0x704   : > { %v1145_v8 = vpop.permute.xlu1 %1144 }
 0x705   : > { %v1153_v10 = vsel %vm1152_vm4, %v1151_v9, %v1145_v8 }
 0x708   : > { %v1149_v11 = vpop.permute.xlu0 %1148 }
 0x709   : > { %v1155_v12 = vsel %vm1154_vm5, %v1153_v10, %v1149_v11 }
 0x70a   : > { %v1156_v13 = vpack.c.bf16 %v1155_v12, %v1155_v12 }
 0x70c   : > { %1692 = vmatmul.mubr.msk.bf16.vlgmr.msra.gmra.mxu0 %vm546_vm1, %v1156_v13 }
 0x70d   : > { %1711 = vmatprep.mubr.msk.bf16.mxu0 %vm1896_vm0, %v1895_v1  ;;  %1704 = vmatpush3.bf16.msra.mxu0 %v1777_v36 }
 0x70e   : > { %1705 = vmatprep.subr.bf16.mxu0 %v1895_v1 }
 0x711   : > { %1706 = vmatpush3.bf16.msra.mxu0 %v1778_v39 }
 0x712   : > { %1707 = vmatprep.subr.bf16.mxu0 %v1895_v1 }
 0x715   : > { %1708 = vmatpush3.bf16.msra.mxu0 %v1779_v40 }
 0x716   : > { %1709 = vmatprep.subr.bf16.mxu0 %v1895_v1 }
 0x719   : > { %1710 = vmatpush3.bf16.msra.mxu0 %v1780_v41 }
 0x7cc   : > { %v1217_v15 = vpop.f32.mrf.mxu0 }
 0x7cd   : > { %v1218_v16 = vadd.f32 %v1569_v14, %v1217_v15 }
 0x7ce   : > { %v1693_v17 = vpop.f32.mrf.mxu0 }
 0x7cf   : > { %v2174_v18 = vadd.f32 %v1218_v16, %v2065_v6  ;;  %v1776_v6 = vld [vmem:[%s2296_s11] sm:$0xff]  }
 0x7d0   : > { %v1220_v19 = vpop.f32.mrf.mxu0  ;;  %1698 = vmatpush3.bf16.msra.mxu1 %v1776_v6 }
 0x7d1   : > { %v1226_v20 = vsel %vm546_vm1, %v2174_v18, 0.0 }
 0x7d2   : > { %1227 = vadd.xlane.f32.xlu1 %v1226_v20  ;;  %v1694_v21 = vpop.f32.mrf.mxu0 }
 0x85b   : > { %v1228_v22 = vpop.xlane.xlu1 %1227 }
 0x85c   : > { %v1229_v23 = vmul.f32 0.03125, %v1228_v22 }
 0x85e   : > { %v1230_v24 = vsub.f32 %v2174_v18, %v1229_v23 }
 0x860   : > { %v1231_v25 = vmul.f32 %v1230_v24, %v1230_v24 }
 0x862   : > { %v1232_v26 = vsel %vm546_vm1, %v1231_v25, 0.0 }
 0x863   : > { %1233 = vadd.xlane.f32.xlu0 %v1232_v26 }
 0x8ec   : > { %v1234_v28 = vpop.xlane.xlu0 %1233 }
 0x8ed   : > { %v1235_v29 = vmul.f32 0.03125, %v1234_v28 }
 0x8ef   : > { %v1236_v30 = vadd.f32 1e-05, %v1235_v29 }
 0x8f1   : > { %1799 = vrsqrt.f32 %v1236_v30 }
 0x8fe   : > { %v1800_v31 = vpop.eup %1799 }
 0x8ff   : > { %v1238_v33 = vmul.f32 %v1800_v31, %v1230_v24 }
 0x901   : > { %v1245_v35 = vmul.f32 %v1573_v32, %v1238_v33 }
 0x903   : > { %v1252_v37 = vadd.f32 %v1574_v34, %v1245_v35 }
 0x905   : > { %v1253_v38 = vpack.c.bf16 %v1252_v37, %v1252_v37 }
 0x907   : > { %1700 = vmatmul.mubr.msk.bf16.vlgmr.msra.gmra.mxu1 %vm546_vm1, %v1253_v38 }
 0x9c7   : > { %v1314_v43 = vpop.f32.mrf.mxu1 }
 0x9c8   : > { %v1315_v44 = vadd.f32 %v1575_v42, %v1314_v43 }
 0x9c9   : > { %v1701_v45 = vpop.f32.mrf.mxu1 }
 0x9ca   : > { %v1320_v46 = vmul.f32 %v1315_v44, %v1315_v44 }
 0x9cb   : > { %v1317_v47 = vpop.f32.mrf.mxu1 }
 0x9cc   : > { %v1321_v48 = vmul.f32 %v1320_v46, %v1315_v44 }
 0x9cd   : > { %v1702_v49 = vpop.f32.mrf.mxu1 }
 0x9ce   : > { %v1322_v50 = vmul.f32 0.044715, %v1321_v48 }
 0x9d0   : > { %v1323_v51 = vadd.f32 %v1322_v50, %v1315_v44 }
 0x9d2   : > { %v1324_v1 = vmul.f32 0.7978846, %v1323_v51 }
 0x9d4   : > { %1801 = vtanh.f32 %v1324_v1 }
 0x9e1   : > { %v1802_v52 = vpop.eup %1801 }
 0x9e2   : > { %v1326_v53 = vadd.f32 1.0, %v1802_v52 }
 0x9e4   : > { %v1327_v54 = vmul.f32 0.5, %v1326_v53 }
 0x9e6   : > { %v1328_v55 = vmul.f32 %v1327_v54, %v1315_v44 }
 0x9e8   : > { %v1329_v56 = vpack.c.bf16 %v1328_v55, %v1328_v55 }
 0x9ea   : > { %1712 = vmatmul.mubr.msk.bf16.vlgmr.msra.gmra.mxu0 %vm1369_vm6, %v1329_v56 }
 0xaaa   : > { %v1407_v58 = vpop.f32.mrf.mxu0 }
 0xaab   : > { %v1408_v59 = vadd.f32 %v1579_v57, %v1407_v58 }
 0xaac   : > { %v1713_v60 = vpop.f32.mrf.mxu0 }
 0xaad   : > { %v1413_v61 = vadd.f32 %v1408_v59, %v2174_v18 }
 0xaae   : > { %v1410_v62 = vpop.f32.mrf.mxu0 }
 0xaaf   : > { %v1414_v63 = vpack.c.bf16 %v1413_v61, %v1413_v61  ;;  %v1417_v0 = vsel %vm546_vm1, %v1413_v61, 0.0 }
 0xab0   : > { %v1418_v2 = vrot.slane %v1417_v0, 4  ;;  %v1714_v3 = vpop.f32.mrf.mxu0 }
 0xab1   : > { %1416 = vst.msk [vmem:[%s516_s26] sm:$0xf] %vm1415_vm7, %v1414_v63 }
 0xab2   : > { %v1419_v4 = vadd.f32 %v1418_v2, %v1417_v0 }
 0xab3   : > { %1816 = shalt.err (!%p1813_p3)
}
 0xab4   : > { %s1817_s26 = scalar_lea.hbm %s2225_s18, 64  ;;  %s1821_s2 = scalar_lea.hbm %s2300_s15, 128 }
 0xab5   : > { %p1818_p4 = scmp.ne.s32.totalorder %s2225_s18, %s1817_s26  ;;  %p1822_p9 = scmp.lt.s32.totalorder %s2225_s18, %s2300_s15 }
 0xab6   : > { %p1823_p10 = scmp.lt.s32.totalorder %s1821_s2, %s1817_s26 }
 0xab7   : > { %p1819_p7 = pnand %p1818_p4, %p2030_p5 }
 0xab8   : > { %p1824_p11 = por %p1823_p10, %p1822_p9 }
 0xab9   : > { %p1820_p8 = pneg %p1819_p7 }
 0xabb   : > { %p1825_p12 = pnand %p1824_p11, %p1820_p8 }
 0xabd   : > { %1828 = shalt.err (!%p1825_p12)
}
 0xabe   : > { %1715 = dma.vmem_to_hbm [thread:$0]  (%p2030_p5), %s2227_s23, 64, %s2225_s18, %s1429_s19   ;;  %v1420_v5 = vrot.slane %v1419_v4, 2  ;;  %vm1426_vm8 = vcmask 253952  }
 0xabf   : > { %s1587_s1 = sshll.u32 %s2013_s25, 4  ;;  %s522_s3 = scalar_lea.vmem [#allocation4], %s2213_s28 }
 0xac0   : > { %v1421_v7 = vadd.f32 %v1420_v5, %v1419_v4  ;;  %s1459_s4 = sshll.u32 %s522_s3, 4  ;;  %s1457_s26 = scalar_lea.hbm %s2301_s16, %s1587_s1  ;;  %s1460_s4 = int_to_ptr.vmem [resolvable:$true] %s1459_s4 }
 0xac1   : > { %s1434_s30 = scalar_lea.sflag [#allocation5], %s2213_s28  ;;  %s1829_s29 = scalar_lea.vmem %s1460_s4, 16 }
 0xac2   : > { %v1422_v8 = vrot.slane %v1421_v7, 1  ;;  %p1830_p13 = scmp.ne.s32.totalorder %s1460_s4, %s1829_s29  ;;  %s1906_s23 = smov [#allocation4]  }
 0xac3   : > { %s1833_s18 = sshll.u32 %s1906_s23, 4  ;;  %s1834_s18 = int_to_ptr.vmem [resolvable:$false] %s1833_s18 }
 0xac4   : > { %v1423_v9 = vadd.f32 %v1422_v8, %v1421_v7  ;;  %p1831_p0 = pnand %p1830_p13, %p2030_p5  ;;  %s1835_s25 = scalar_lea.vmem %s1834_s18, 32 }
 0xac5   : > { %p1836_p2 = scmp.lt.s32.totalorder %s1460_s4, %s1834_s18  ;;  %p1837_p3 = scmp.lt.s32.totalorder %s1835_s25, %s1829_s29 }
 0xac6   : > { %v1425_v10 = vmul.f32 0.125, %v1423_v9  ;;  %p1832_p1 = pneg %p1831_p0 }
 0xac7   : > { %p1838_p4 = por %p1837_p3, %p1836_p2 }
 0xac8   : > { %1427 = vst.msk [vmem:[%s522_s3] sm:$0x1] %vm1426_vm8, %v1425_v10 }
 0xac9   : > { %p1839_p7 = pnand %p1838_p4, %p1832_p1 }
 0xacb   : > { %1842 = shalt.err (!%p1839_p7)
}
 0xacc   : > { %s1843_s19 = scalar_lea.hbm %s1457_s26, 16  ;;  %s1847_s1 = scalar_lea.hbm %s2301_s16, 32 }
 0xacd   : > { %p1844_p8 = scmp.ne.s32.totalorder %s1457_s26, %s1843_s19  ;;  %p1848_p11 = scmp.lt.s32.totalorder %s1457_s26, %s2301_s16 }
 0xace   : > { %p1849_p12 = scmp.lt.s32.totalorder %s1847_s1, %s1843_s19 }
 0xacf   : > { %p1845_p9 = pnand %p1844_p8, %p2030_p5 }
 0xad0   : > { %p1850_p13 = por %p1849_p12, %p1848_p11 }
 0xad1   : > { %p1846_p10 = pneg %p1845_p9 }
 0xad3   : > { %p1851_p0 = pnand %p1850_p13, %p1846_p10 }
 0xad5   : > { %1854 = shalt.err (!%p1851_p0)
}
 0xad6   : > { %1716 = dma.vmem_to_hbm [thread:$0]  (%p2030_p5), %s1460_s4, 16, %s1457_s26, %s1434_s30  }
 0xad7 PF: > { %p1726_p1 = scmp.ge.s32.totalorder %s1893_s24, 2  ;;  %s1471_s20 = sand.u32 1, %s1881_s21  }
 0xad8   : > { %s1472_s29 = scalar_lea.sflag [#allocation3], %s1471_s20 }
 0xad9   : > { %p1720_p2 = pnand %p1726_p1, %p2034_p6 }
 0xadb   : > { %p1721_p3 = pneg %p1720_p2 }
 0xadd   : > { %1872 = dma.done.wait (%p1721_p3), %s1472_s29, 64  }
 0xade   : > { %1874 = vsyncadd (%p1721_p3), %s1472_s29, 4294967232  ;;  %s1481_s23 = scalar_lea.sflag [#allocation5], %s1471_s20 }
 0xadf   : > { %1876 = dma.done.wait (%p1721_p3), %s1481_s23, 16  }
 0xae0   : > { %1878 = vsyncadd (%p1721_p3), %s1481_s23, 4294967280  ;;  %s2319_s18 = sld [smem:[#allocation8_spill]]  ;;  %p30_p5 = scmp.ge.s32.totalorder %s2017_s27, 4  }
 0xae1   : > { %s2320_s23 = sld [smem:[#allocation9_spill]]  ;;  %s2321_s21 = smov %s1885_s22 }
 0xae2   : > { %s2323_s24 = smov %s2017_s27  ;;  %32 = sbr.rel (!%p30_p5) target bundleno = 12 (0xc), region = 132 }
 0xae6   : > { %s2322_s22 = smov %s2319_s18 }
 0xae7   :  { %1485 = vsyncpa [#allocation3], 1 }
 0xae8   :  { %1487 = vsyncpa [#allocation3 + $0x1], 1 }
 0xae9   :  { %1488 = vsyncpa [#allocation5], 1 }
 0xaea   :  { %1490 = vsyncpa [#allocation5 + $0x1], 1 }

</bundles_post_ra>
